<compile_context>
chip_gen: v5e
topology: v5e:2x2
jax: 0.10.0
libtpu: 0.0.40
codegen_flags: <defaults>
</compile_context>

<pallas_src>
import jax
import jax.numpy as jnp
from jax import lax
from jax.experimental import pallas as pl
from jax.experimental.pallas import tpu as pltpu


def _mycell_scan_kernel(xs_ref, h0_ref, wt_ref, bmat_ref, out_ref, g_ref):
    """Fused MyCell recurrence.

    Shapes (zero-padded to (8, 128) tiles in the wrapper):
      xs_ref  : (T, Bp, Fp)  per-step inputs
      h0_ref  : (Bp, Fp)     initial hidden state (padded rows/cols are 0)
      wt_ref  : (Fp, Fp)     W^T (in, out); padded columns are exactly 0
      bmat_ref: (Bp, Fp)     bias replicated on real rows only, 0 elsewhere
      out_ref : (Bp, Fp)     final hidden state (buffer aliased with h0)
      g_ref   : (T, Bp, Fp)  VMEM scratch holding the pre-gated linears
    """
    n_steps, bp, fp = xs_ref.shape

    # ---- Phase 1: everything that does not depend on h, batched over T. ----
    xs = xs_ref[...]                                        # (T, Bp, Fp)
    # One MXU matmul for all steps; reshape is (8,128)-tile aligned (no copy).
    y = jnp.dot(xs.reshape(n_steps * bp, fp), wt_ref[...],
                preferred_element_type=jnp.float32)
    y = y.reshape(n_steps, bp, fp) + bmat_ref[...][None]    # (T, Bp, Fp)

    # Decision gate: padded rows/cols of y are exactly 0, so the unmasked
    # full-tile sum equals the logical sum over the real (B, F) block.
    s = jnp.sum(y, axis=2, keepdims=True)                   # (T, Bp, 1) lane reduce
    s = jnp.sum(s, axis=1, keepdims=True)                   # (T, 1, 1)  sublane reduce
    sgn = jnp.where(s > 0.0, 1.0, -1.0).astype(jnp.float32)  # sum==0 -> -y (torch else)
    g_ref[...] = y * sgn                                     # gate folded into G_t

    # ---- Phase 2: the only truly serial part: h <- tanh(G_t + h). ----------
    def step(t, h):
        return jnp.tanh(g_ref[t] + h)                        # VPU add + EUP tanh

    h = lax.fori_loop(0, n_steps, step, h0_ref[...],
                      unroll=min(int(n_steps), 8))
    out_ref[...] = h


def _pad_to(n, m):
    return ((n + m - 1) // m) * m


def mycell_scan(xs, h0, w, b):
    """Run T MyCell steps in a single pallas_call; returns the final h (B, F).

    xs: (T, B, F) per-step inputs, h0: (B, F),
    w: (F, F) torch Linear weight in (out, in) layout, b: (F,) bias.
    """
    T, B, F = xs.shape
    Bp = _pad_to(B, 8)      # sublane tile
    Fp = _pad_to(F, 128)    # lane tile
    f32 = jnp.float32

    # Zero-pad to native (8, 128) vreg tiles.  Padded W^T columns / bias
    # entries / h rows are exactly 0 so the gate sum and tanh on the logical
    # (B, F) slice are unchanged (requirement flagged in the perf review).
    xs_p = jnp.zeros((T, Bp, Fp), f32).at[:, :B, :F].set(xs.astype(f32))
    h_p = jnp.zeros((Bp, Fp), f32).at[:B, :F].set(h0.astype(f32))
    wt_p = jnp.zeros((Fp, Fp), f32).at[:F, :F].set(jnp.asarray(w, f32).T)
    bmat = jnp.zeros((Bp, Fp), f32).at[:B, :F].set(
        jnp.broadcast_to(jnp.asarray(b, f32), (B, F)))

    nbytes = 4 * (xs_p.size + h_p.size + wt_p.size + bmat.size + Bp * Fp)
    out = pl.pallas_call(
        _mycell_scan_kernel,
        out_shape=jax.ShapeDtypeStruct((Bp, Fp), f32),
        in_specs=[pl.BlockSpec(memory_space=pltpu.MemorySpace.VMEM)] * 4,
        out_specs=pl.BlockSpec(memory_space=pltpu.MemorySpace.VMEM),
        scratch_shapes=[pltpu.VMEM((T, Bp, Fp), f32)],
        # Hidden state updated in place: h0's (padded) buffer is reused for
        # the output, so the state never round-trips a fresh HBM buffer.
        input_output_aliases={1: 0},
        cost_estimate=pl.CostEstimate(
            flops=2 * T * Bp * Fp * Fp + 4 * T * Bp * Fp,
            transcendentals=T * Bp * Fp,
            bytes_accessed=nbytes),
    )(xs_p, h_p, wt_p, bmat)
    # TODO(synk): for very large T, stream xs / G over an 'arbitrary' grid
    # axis (blocks of T) instead of keeping them fully VMEM-resident
    # (v5e 16 MiB / v7x 32 MiB scoped-VMEM defaults); trivial at these sizes.
    return out[:B, :F]


def mycell_forward(x, h, w, b):
    """The module's forward: exactly one MyCell step; returns (new_h, new_h)."""
    new_h = mycell_scan(x[None], h, w, b)
    return new_h, new_h


if __name__ == "__main__":
    key = jax.random.PRNGKey(0)
    kx, kh, kw, kb, ks = jax.random.split(key, 5)

    # Shapes implied by the module: x, h in (3, 4); Linear(4, 4).
    B, F = 3, 4
    x = jax.random.uniform(kx, (B, F), dtype=jnp.float32)
    h = jax.random.uniform(kh, (B, F), dtype=jnp.float32)
    w = jax.random.uniform(kw, (F, F), dtype=jnp.float32) * 0.5 - 0.25  # (out, in)
    b = jax.random.uniform(kb, (F,), dtype=jnp.float32) * 0.5 - 0.25

    def ref_step(x_t, h_t):
        y = x_t @ w.T + b
        y = jnp.where(jnp.sum(y) > 0.0, y, -y)
        return jnp.tanh(y + h_t)

    # --- single step: the module's forward semantics ---
    new_h, new_h2 = mycell_forward(x, h, w, b)
    jax.block_until_ready(new_h)
    ref = ref_step(x, h)
    assert jnp.allclose(new_h, ref, atol=1e-5, rtol=1e-5)
    assert jnp.array_equal(new_h, new_h2)

    # --- amortized recurrence: T steps fused into ONE pallas_call ---
    T = 8
    xs = jax.random.uniform(ks, (T, B, F), dtype=jnp.float32)
    h_final = mycell_scan(xs, h, w, b)
    jax.block_until_ready(h_final)

    h_ref = h
    for t in range(T):
        h_ref = ref_step(xs[t], h_ref)
    assert jnp.allclose(h_final, h_ref, atol=1e-5, rtol=1e-5)

    print("KERNEL_OK")
</pallas_src>

<mosaic_0001>
module attributes {stable_mosaic.version = 11 : i64} {
  func.func @_mycell_scan_kernel(%arg0: memref<1x8x128xf32, #tpu.memory_space<vmem>>, %arg1: memref<8x128xf32, #tpu.memory_space<vmem>>, %arg2: memref<128x128xf32, #tpu.memory_space<vmem>>, %arg3: memref<8x128xf32, #tpu.memory_space<vmem>>, %arg4: memref<8x128xf32, #tpu.memory_space<vmem>>, %arg5: memref<1x8x128xf32, #tpu.memory_space<vmem>>) attributes {dimension_semantics = [], scalar_prefetch = 0 : i64, scratch_operands = 1 : i64, tpu.core_type = #tpu.core_type<tc>} {
    %c0 = arith.constant 0 : index
    %c0_0 = arith.constant 0 : index
    %c0_1 = arith.constant 0 : index
    %0 = vector.load %arg0[%c0, %c0_0, %c0_1] : memref<1x8x128xf32, #tpu.memory_space<vmem>>, vector<1x8x128xf32>
    %1 = vector.shape_cast %0 : vector<1x8x128xf32> to vector<8x128xf32>
    %c0_2 = arith.constant 0 : index
    %c0_3 = arith.constant 0 : index
    %2 = vector.load %arg2[%c0_2, %c0_3] : memref<128x128xf32, #tpu.memory_space<vmem>>, vector<128x128xf32>
    %cst = arith.constant dense<0.000000e+00> : vector<8x128xf32>
    %3 = tpu.matmul %1, %2, %cst {dimension_numbers = #tpu.dot_dimension_numbers<[1], [0], [0], [1], [0, 0, 1, 1], [], []>} : vector<8x128xf32>, vector<128x128xf32>, vector<8x128xf32> -> vector<8x128xf32>
    %4 = vector.shape_cast %3 : vector<8x128xf32> to vector<1x8x128xf32>
    %c0_4 = arith.constant 0 : index
    %c0_5 = arith.constant 0 : index
    %5 = vector.load %arg3[%c0_4, %c0_5] : memref<8x128xf32, #tpu.memory_space<vmem>>, vector<8x128xf32>
    %6 = vector.shape_cast %5 : vector<8x128xf32> to vector<1x8x128xf32>
    %7 = arith.addf %4, %6 : vector<1x8x128xf32>
    %cst_6 = arith.constant dense<0.000000e+00> : vector<1x8xf32>
    %8 = vector.multi_reduction <add>, %7, %cst_6 [2] : vector<1x8x128xf32> to vector<1x8xf32>
    %9 = vector.shape_cast %8 : vector<1x8xf32> to vector<1x8x1xf32>
    %cst_7 = arith.constant dense<0.000000e+00> : vector<1x1xf32>
    %10 = vector.multi_reduction <add>, %9, %cst_7 [1] : vector<1x8x1xf32> to vector<1x1xf32>
    %11 = vector.shape_cast %10 : vector<1x1xf32> to vector<1x1x1xf32>
    %cst_8 = arith.constant 0.000000e+00 : f32
    %12 = vector.broadcast %cst_8 : f32 to vector<1x1x1xf32>
    %13 = arith.cmpf ogt, %11, %12 : vector<1x1x1xf32>
    %cst_9 = arith.constant 1.000000e+00 : f32
    %cst_10 = arith.constant -1.000000e+00 : f32
    %14 = vector.broadcast %cst_9 : f32 to vector<1x1x1xf32>
    %15 = vector.broadcast %cst_10 : f32 to vector<1x1x1xf32>
    %16 = arith.select %13, %14, %15 : vector<1x1x1xi1>, vector<1x1x1xf32>
    %17 = vector.broadcast %16 : vector<1x1x1xf32> to vector<1x8x128xf32>
    %18 = arith.mulf %7, %17 : vector<1x8x128xf32>
    %c0_11 = arith.constant 0 : index
    %c0_12 = arith.constant 0 : index
    %c0_13 = arith.constant 0 : index
    %19 = vector.load %arg5[%c0_11, %c0_12, %c0_13] : memref<1x8x128xf32, #tpu.memory_space<vmem>>, vector<1x8x128xf32>
    tpu.vector_store %arg5[%c0_11, %c0_12, %c0_13], %18 {strides = array<i32>} : memref<1x8x128xf32, #tpu.memory_space<vmem>>, vector<1x8x128xf32>,
    %c0_14 = arith.constant 0 : index
    %c0_15 = arith.constant 0 : index
    %20 = vector.load %arg1[%c0_14, %c0_15] : memref<8x128xf32, #tpu.memory_space<vmem>>, vector<8x128xf32>
    %c0_i32 = arith.constant 0 : i32
    %21 = arith.index_cast %c0_i32 : i32 to index
    %c0_16 = arith.constant 0 : index
    %c0_17 = arith.constant 0 : index
    %22 = vector.load %arg5[%21, %c0_16, %c0_17] : memref<1x8x128xf32, #tpu.memory_space<vmem>>, vector<1x8x128xf32>
    %23 = vector.shape_cast %22 : vector<1x8x128xf32> to vector<8x128xf32>
    %24 = arith.addf %23, %20 : vector<8x128xf32>
    %25 = math.tanh %24 : vector<8x128xf32>
    %c1_i32 = arith.constant 1 : i32
    %c0_18 = arith.constant 0 : index
    %c0_19 = arith.constant 0 : index
    %26 = vector.load %arg4[%c0_18, %c0_19] : memref<8x128xf32, #tpu.memory_space<vmem>>, vector<8x128xf32>
    tpu.vector_store %arg4[%c0_18, %c0_19], %25 {strides = array<i32>} : memref<8x128xf32, #tpu.memory_space<vmem>>, vector<8x128xf32>,
    return
  }
}

</mosaic_0001>

<bundles_post_ra>
// kernel: tpu_custom_call.1
= control target key start
LH: loop header
LB: loop body
LE: loop exit
PB: predicated region body
PF: predicated region fallthrough
CT: control target
= control target key end

     0   :  { %9 = vsyncpa [#allocation4], 0  ;;  %s254_s0 = inlined_call_operand.vmem [shape: f32[1,8,128], index: 0, kind: input, shape index: {}]   ;;  %s255_s1 = inlined_call_operand.hbm [shape: f32[8,128], index: 1, kind: input, shape index: {}, may-alias: {1,4}]   ;;  %s256_s2 = inlined_call_operand.hbm [shape: f32[128,128], index: 2, kind: input, shape index: {}]   ;;  %s257_s3 = inlined_call_operand.vmem [shape: f32[8,128], index: 3, kind: input, shape index: {}]   ;;  %s258_s4 = inlined_call_operand.hbm [shape: f32[8,128], index: 4, kind: output, shape index: {}, may-alias: {1,4}]  }
   0x1   :  { %10 = vsyncpa [#allocation7], 0 }
   0x2   :  { %11 = vsyncpa [#allocation5], 0  ;;  %s19_s17 = sshll.u32 %s255_s1, 4  ;;  %s208_s18 = smov [#allocation3]   ;;  %s20_s17 = int_to_ptr.hbm [resolvable:$true] %s19_s17 }
   0x3   :  { %s21_s19 = sshll.u32 %s208_s18, 4  ;;  %s29_s22 = sshll.u32 %s256_s2, 4  ;;  %s22_s19 = int_to_ptr.vmem [resolvable:$true] %s21_s19  ;;  %s30_s22 = int_to_ptr.hbm [resolvable:$true] %s29_s22 }
   0x4   :  { %24 = dma.hbm_to_vmem [thread:$0]  %s20_s17, 128, %s22_s19, [#allocation4]  }
   0x5   :  { %s209_s23 = smov [#allocation6]   ;;  %s210_s25 = smov 128  }
   0x6   :  { %s31_s24 = sshll.u32 %s209_s23, 4  ;;  %s211_s26 = smov 8   ;;  %s32_s24 = int_to_ptr.vmem [resolvable:$true] %s31_s24 }
   0x7   :  { %37 = dma.hbm_to_vmem [thread:$0]  %s30_s22, 2048, %s32_s24, [#allocation7], %s210_s25, %s210_s25, %s211_s26  }
   0x8   :  { %202 = dma.done.wait [#allocation4], 128  }
   0x9   :  { %203 = vsyncadd [#allocation4], 4294967168 }
   0xa   :  { %204 = dma.done.wait [#allocation7], 2048  }
   0xb   :  { %205 = vsyncadd [#allocation7], 4294965248  ;;  %v64_v0 = vld [vmem:[#allocation6 + $0x78] sm:$0xff]  ;;  %v63_v1 = vld [vmem:[#allocation6 + $0x70] sm:$0xff]  ;;  %v212_v27 = vmov -1.0   ;;  %s111_s5 = sshll.u32 %s258_s4, 4  ;;  %s112_s5 = int_to_ptr.hbm [resolvable:$true] %s111_s5 }
   0xc   :  { %65 = vmatpush.msra.mxu0 %v64_v0  ;;  %v62_v2 = vld [vmem:[#allocation6 + $0x68] sm:$0xff]  ;;  %v61_v3 = vld [vmem:[#allocation6 + $0x60] sm:$0xff]  ;;  %v60_v4 = vld [vmem:[#allocation6 + $0x58] sm:$0xff] }
   0xd   :  { %v59_v5 = vld [vmem:[#allocation6 + $0x50] sm:$0xff]  ;;  %v58_v6 = vld [vmem:[#allocation6 + $0x48] sm:$0xff]  ;;  %v57_v7 = vld [vmem:[#allocation6 + $0x40] sm:$0xff] }
   0xe   :  { %66 = vmatpush.msra.mxu0 %v63_v1  ;;  %v56_v8 = vld [vmem:[#allocation6 + $0x38] sm:$0xff]  ;;  %v55_v9 = vld [vmem:[#allocation6 + $0x30] sm:$0xff]  ;;  %v54_v10 = vld [vmem:[#allocation6 + $0x28] sm:$0xff] }
   0xf   :  { %v53_v11 = vld [vmem:[#allocation6 + $0x20] sm:$0xff]  ;;  %v52_v12 = vld [vmem:[#allocation6 + $0x18] sm:$0xff]  ;;  %v51_v13 = vld [vmem:[#allocation6 + $0x10] sm:$0xff] }
  0x10   :  { %67 = vmatpush.msra.mxu0 %v62_v2  ;;  %v50_v14 = vld [vmem:[#allocation6 + $0x8] sm:$0xff]  ;;  %v49_v15 = vld [vmem:[#allocation6] sm:$0xff]  ;;  %v48_v16 = vld [vmem:[%s254_s0] sm:$0xff]  ;;  %s213_s0 = smov [#allocation8]  }
  0x11   :  { %v85_v17 = vld [vmem:[%s257_s3] sm:$0xff]  ;;  %s109_s29 = sshll.u32 %s213_s0, 4  ;;  %s110_s29 = int_to_ptr.vmem [resolvable:$true] %s109_s29 }
  0x12   :  { %68 = vmatpush.msra.mxu0 %v61_v3  ;;  %v99_v29 = vld [vmem:[#allocation3] sm:$0xff] }
  0x14   :  { %69 = vmatpush.msra.mxu0 %v60_v4 }
  0x16   :  { %70 = vmatpush.msra.mxu0 %v59_v5 }
  0x18   :  { %71 = vmatpush.msra.mxu0 %v58_v6 }
  0x1a   :  { %72 = vmatpush.msra.mxu0 %v57_v7 }
  0x1c   :  { %73 = vmatpush.msra.mxu0 %v56_v8 }
  0x1e   :  { %74 = vmatpush.msra.mxu0 %v55_v9 }
  0x20   :  { %75 = vmatpush.msra.mxu0 %v54_v10 }
  0x22   :  { %76 = vmatpush.msra.mxu0 %v53_v11 }
  0x24   :  { %77 = vmatpush.msra.mxu0 %v52_v12 }
  0x26   :  { %78 = vmatpush.msra.mxu0 %v51_v13 }
  0x28   :  { %79 = vmatpush.msra.mxu0 %v50_v14 }
  0x2a   :  { %80 = vmatpush.msra.mxu0 %v49_v15 }
  0x2b   :  { %81 = vmatmul.f32.vlgmr.msra.gmra.mxu0 %v48_v16 }
  0xa8   :  { %v82_v18 = vpop.f32.mrf.mxu0 }
  0xa9   :  { %v86_v19 = vadd.f32 %v85_v17, %v82_v18 }
  0xab   :  { %87 = vadd.xlane.f32.xlu0 %v86_v19 }
 0x11e   :  { %v88_v20 = vpop.xlane.xlu0 %87 }
 0x11f   :  { %v89_v21 = vrot.slane %v88_v20, 4 }
 0x121   :  { %v90_v22 = vadd.f32 %v89_v21, %v88_v20 }
 0x123   :  { %v91_v23 = vrot.slane %v90_v22, 2 }
 0x125   :  { %v92_v24 = vadd.f32 %v91_v23, %v90_v22 }
 0x127   :  { %v93_v25 = vrot.slane %v92_v24, 1 }
 0x129   :  { %v94_v26 = vadd.f32 %v93_v25, %v92_v24 }
 0x12b   :  { %vm95_vm0 = vcmp.gt.f32.partialorder %v94_v26, 0.0 }
 0x12c   :  { %v96_v28 = vsel %vm95_vm0, 1.0, %v212_v27 }
 0x12d   :  { %v97_v30 = vmul.f32 %v96_v28, %v86_v19 }
 0x12f   :  { %v101_v31 = vadd.f32 %v99_v29, %v97_v30 }
 0x131   :  { %128 = vtanh.f32 %v101_v31 }
 0x137   :  { %v129_v32 = vpop.eup %128 }
 0x138   :  { %103 = vst [vmem:[#allocation8] sm:$0xff] %v129_v32 }
 0x139   :  { %114 = dma.vmem_to_hbm [thread:$0]  %s110_s29, 128, %s112_s5, [#allocation5]  }
 0x13a   :  { %206 = dma.done.wait [#allocation5], 128  }
 0x13b   :  { %207 = vsyncadd [#allocation5], 4294967168 }
 0x13c   :  { %119 = vsyncpa [#allocation4], 1 }
 0x13d   :  { %120 = vsyncpa [#allocation7], 1 }
 0x13e   :  { %121 = vsyncpa [#allocation5], 1 }

</bundles_post_ra>
